<compile_context>
chip_gen: v7x
topology: tpu7x:2x2x1
jax: 0.10.0
libtpu: 0.0.40
codegen_flags: <defaults>
</compile_context>

<pallas_src>
import functools

import jax
import jax.numpy as jnp
from jax.experimental import pallas as pl
from jax.experimental.pallas import tpu as pltpu


def _tensorcores_per_chip():
    """Best-effort TensorCore-per-chip count (2 on v7x, 1 on v5e/v6e)."""
    try:
        info = pltpu.get_tpu_info()
        for name in ("num_cores", "core_count", "num_tensorcores",
                     "tensorcores_per_chip", "cores_per_chip"):
            v = getattr(info, name, None)
            if isinstance(v, int) and v > 1:
                return v
    except Exception:
        pass
    try:
        kind = jax.devices()[0].device_kind.lower()
    except Exception:
        return 1
    return 2 if "v7" in kind else 1


def _ce_partial_kernel(x_ref, t_ref, o_ref, *scratch, n_valid, tn,
                       tiles_per_core, first_pad_block, has_padding):
    """Accumulate the sum of per-sample cross-entropy over this core's row tiles."""
    ci = pl.program_id(0)          # core-split index
    ti = pl.program_id(1)          # row-tile index within this core
    block_idx = ci * tiles_per_core + ti

    x = x_ref[...]                 # (TN, C) logits, input dtype
    tgt = t_ref[...]               # (TN, 1) int32

    # Numerically stable per-row log-sum-exp; the f32 cast is fused into the
    # exp operand (no separate whole-tile f32 copy of x).
    m = jnp.max(x, axis=-1, keepdims=True)                                   # (TN,1)
    sumexp = jnp.sum(jnp.exp((x - m).astype(jnp.float32)),
                     axis=-1, keepdims=True)                                 # (TN,1)
    lse = m.astype(jnp.float32) + jnp.log(sumexp)                            # (TN,1)

    # Gather the target-class logit with a one-hot select (no dynamic gather
    # on TPU).  The row sum has a single non-zero term, so it is exact in the
    # input dtype; cast only the (TN,1) result.
    cls_idx = jax.lax.broadcasted_iota(jnp.int32, x.shape, 1)                # (TN,C)
    tgt_logit = jnp.sum(jnp.where(cls_idx == tgt, x, 0.0),
                        axis=-1, keepdims=True).astype(jnp.float32)          # (TN,1)

    per_sample_ce = lse - tgt_logit                                          # (TN,1)

    def _masked(ce):
        row = block_idx * tn + jax.lax.broadcasted_iota(jnp.int32, (tn, 1), 0)
        return jnp.where(row < n_valid, ce, 0.0)

    if tiles_per_core == 1:
        # Single tile per core: reduce once and write the lane-dense output.
        ce = _masked(per_sample_ce) if has_padding else per_sample_ce
        o_ref[...] = jnp.full(o_ref.shape, jnp.sum(ce), dtype=jnp.float32)
        return

    acc_ref = scratch[0]           # (TN,1) f32 VMEM running per-row CE sums

    @pl.when(ti == 0)
    def _():
        acc_ref[...] = jnp.zeros_like(acc_ref)

    if not has_padding:
        acc_ref[...] += per_sample_ce
    else:
        # Only the trailing block(s) contain padded rows; earlier blocks skip
        # the iota/compare/select mask work entirely.
        @pl.when(block_idx < first_pad_block)
        def _():
            acc_ref[...] += per_sample_ce

        @pl.when(block_idx >= first_pad_block)
        def _():
            acc_ref[...] += _masked(per_sample_ce)

    @pl.when(ti == tiles_per_core - 1)
    def _():
        # One reduce-to-scalar per core, one lane-dense (1,8,128) write.
        o_ref[...] = jnp.full(o_ref.shape, jnp.sum(acc_ref[...]),
                              dtype=jnp.float32)


def _pick_row_tile(n, c, itemsize):
    """Row tile sized by bytes: target ~2 MiB of logits per tile, clamp only
    to N (plus a generous 8192-row cap so the per-row accumulator stays small
    for tiny C)."""
    align = max(8, 32 // max(1, itemsize))          # sublane alignment per dtype
    budget = 2 * 1024 * 1024
    rows = budget // max(1, c * itemsize)
    rows = max(align, min(rows, 8192))
    rows -= rows % align
    n_up = ((n + align - 1) // align) * align
    return min(rows, n_up)


def focal_loss(inputs, targets, alpha=1.0, gamma=2.0, reduce=True):
    """inputs: (N, C) float logits; targets: (N,) int class indices.

    Matches the PyTorch module: the focal modulation is applied to the *mean*
    cross-entropy (pt = exp(-mean CE)); `reduce` is accepted for API parity
    (torch.mean of a scalar is the scalar, so both branches return the same
    value).
    """
    n, c = inputs.shape
    itemsize = jnp.dtype(inputs.dtype).itemsize
    tn = _pick_row_tile(n, c, itemsize)

    nb = -(-n // tn)                                  # total row tiles
    cores = _tensorcores_per_chip()
    nc = cores if (cores > 1 and nb >= cores) else 1  # no padded split on 1-TC chips
    tiles_per_core = -(-nb // nc)
    n_pad = nc * tiles_per_core * tn

    x = inputs
    t2 = targets.astype(jnp.int32).reshape(n, 1)
    if n_pad != n:
        x = jnp.pad(x, ((0, n_pad - n), (0, 0)))
        t2 = jnp.pad(t2, ((0, n_pad - n), (0, 0)))

    kernel = functools.partial(
        _ce_partial_kernel, n_valid=n, tn=tn, tiles_per_core=tiles_per_core,
        first_pad_block=n // tn, has_padding=(n_pad != n))

    # Explicit VMEM budget: 2x double-buffered logits tile + ~6x whole-tile f32
    # intermediates + per-row accumulator, clamped below v7x's 64 MiB physical
    # (and above v5e's 16 MiB scoped default).
    f32_tile = tn * c * 4
    acc_bytes = tn * 512 if tiles_per_core > 1 else 0
    vmem_bytes = 2 * tn * c * itemsize + 6 * f32_tile + acc_bytes + (2 << 20)
    vmem_bytes = int(min(max(vmem_bytes, 16 << 20), 48 << 20))

    scratch = [pltpu.VMEM((tn, 1), jnp.float32)] if tiles_per_core > 1 else []

    if nc > 1:
        # Guaranteed 2-TensorCore split on multi-TC chips (v7x); fall back to
        # plain "parallel" if CORE_PARALLEL is unavailable / rejected.
        semantics_options = []
        core_par = getattr(pltpu, "CORE_PARALLEL", None)
        arb = getattr(pltpu, "ARBITRARY", "arbitrary")
        if core_par is not None:
            semantics_options.append((core_par, arb))
        semantics_options.append(("parallel", "arbitrary"))
    else:
        semantics_options = [("arbitrary", "arbitrary")]

    def run(dims):
        return pl.pallas_call(
            kernel,
            out_shape=jax.ShapeDtypeStruct((nc, 8, 128), jnp.float32),
            grid=(nc, tiles_per_core),
            in_specs=[
                pl.BlockSpec((tn, c), lambda ci, ti: (ci * tiles_per_core + ti, 0)),
                pl.BlockSpec((tn, 1), lambda ci, ti: (ci * tiles_per_core + ti, 0)),
            ],
            out_specs=pl.BlockSpec((1, 8, 128), lambda ci, ti: (ci, 0, 0)),
            scratch_shapes=scratch,
            compiler_params=pltpu.CompilerParams(
                dimension_semantics=dims, vmem_limit_bytes=vmem_bytes),
        )(x, t2)

    partial_sums = None
    for i, dims in enumerate(semantics_options):
        if i == len(semantics_options) - 1:
            partial_sums = run(dims)
        else:
            try:
                partial_sums = run(dims)
                break
            except Exception:
                continue

    # tiny scalar epilogue in plain JAX: mean CE + focal transform
    ce = jnp.sum(partial_sums[:, 0, 0]) / jnp.float32(n)
    one_minus_pt = -jnp.expm1(-ce)          # == 1 - exp(-ce), no cancellation
    g = float(gamma)
    if g == 2.0:
        mod = one_minus_pt * one_minus_pt   # avoid float pow (exp+log pair)
    elif g == 1.0:
        mod = one_minus_pt
    elif g == 0.0:
        mod = jnp.float32(1.0)
    else:
        mod = one_minus_pt ** g
    loss = jnp.float32(alpha) * mod * ce
    # reduce=True -> torch.mean of a scalar is the same scalar.
    return loss


def _focal_loss_reference(inputs, targets, alpha=1.0, gamma=2.0):
    # pure-JAX reference mirroring nn.CrossEntropyLoss (mean) + focal transform
    logp = jax.nn.log_softmax(inputs.astype(jnp.float32), axis=-1)
    nll = -jnp.take_along_axis(logp, targets[:, None].astype(jnp.int32), axis=-1)
    ce = jnp.mean(nll)
    pt = jnp.exp(-ce)
    return alpha * (1.0 - pt) ** gamma * ce


if __name__ == "__main__":
    key = jax.random.PRNGKey(0)
    k1, k2, k3, k4, k5, k6 = jax.random.split(key, 6)

    # (1) small shape matching the module's expected (N, C) logits / (N,) targets
    N, C = 8, 32
    inputs = jax.random.normal(k1, (N, C), dtype=jnp.float32)
    targets = jax.random.randint(k2, (N,), 0, C, dtype=jnp.int32)
    loss = jax.block_until_ready(focal_loss(inputs, targets, alpha=1.0, gamma=2.0))
    ref = _focal_loss_reference(inputs, targets, alpha=1.0, gamma=2.0)
    assert jnp.allclose(loss, ref, rtol=1e-5, atol=1e-5), (loss, ref)

    # (2) single large tile with row padding + tail masking
    N2, C2 = 777, 384
    inputs2 = jax.random.normal(k3, (N2, C2), dtype=jnp.float32)
    targets2 = jax.random.randint(k4, (N2,), 0, C2, dtype=jnp.int32)
    loss2 = jax.block_until_ready(focal_loss(inputs2, targets2))
    ref2 = _focal_loss_reference(inputs2, targets2)
    assert jnp.allclose(loss2, ref2, rtol=1e-5, atol=1e-5), (loss2, ref2)

    # (3) multi-tile grid exercising the VMEM vector accumulator + tail-block mask
    N3, C3 = 3000, 384
    inputs3 = jax.random.normal(k5, (N3, C3), dtype=jnp.float32)
    targets3 = jax.random.randint(k6, (N3,), 0, C3, dtype=jnp.int32)
    loss3 = jax.block_until_ready(focal_loss(inputs3, targets3))
    ref3 = _focal_loss_reference(inputs3, targets3)
    assert jnp.allclose(loss3, ref3, rtol=1e-5, atol=1e-5), (loss3, ref3)

    print("KERNEL_OK")
</pallas_src>

<mosaic_0001>
module attributes {stable_mosaic.version = 11 : i64} {
  func.func @_ce_partial_kernel(%arg0: i32, %arg1: i32, %arg2: memref<8x32xf32, #tpu.memory_space<vmem>>, %arg3: memref<8x1xi32, #tpu.memory_space<vmem>>, %arg4: memref<1x8x128xf32, #tpu.memory_space<vmem>>) attributes {dimension_semantics = [#tpu.dimension_semantics<arbitrary>, #tpu.dimension_semantics<arbitrary>], iteration_bounds = array<i64: 1, 1>, scalar_prefetch = 0 : i64, scratch_operands = 0 : i64, tpu.core_type = #tpu.core_type<tc>, window_params = [{transform_indices = @transform_0, window_bounds = array<i64: 8, 32>}, {transform_indices = @transform_1, window_bounds = array<i64: 8, 1>}, {transform_indices = @transform_2, window_bounds = array<i64: 1, 8, 128>}]} {
    %c0 = arith.constant 0 : index
    %c0_0 = arith.constant 0 : index
    %0 = vector.load %arg2[%c0, %c0_0] : memref<8x32xf32, #tpu.memory_space<vmem>>, vector<8x32xf32>
    %c0_1 = arith.constant 0 : index
    %c0_2 = arith.constant 0 : index
    %1 = vector.load %arg3[%c0_1, %c0_2] : memref<8x1xi32, #tpu.memory_space<vmem>>, vector<8x1xi32>
    %cst = arith.constant dense<0xFF800000> : vector<8xf32>
    %2 = vector.multi_reduction <maximumf>, %0, %cst [1] : vector<8x32xf32> to vector<8xf32>
    %3 = vector.shape_cast %2 : vector<8xf32> to vector<8x1xf32>
    %4 = vector.broadcast %3 : vector<8x1xf32> to vector<8x32xf32>
    %5 = arith.subf %0, %4 : vector<8x32xf32>
    %6 = math.exp %5 : vector<8x32xf32>
    %cst_3 = arith.constant dense<0.000000e+00> : vector<8xf32>
    %7 = vector.multi_reduction <add>, %6, %cst_3 [1] : vector<8x32xf32> to vector<8xf32>
    %8 = vector.shape_cast %7 : vector<8xf32> to vector<8x1xf32>
    %9 = math.log %8 : vector<8x1xf32>
    %10 = arith.addf %3, %9 : vector<8x1xf32>
    %11 = tpu.iota {dimensions = array<i32: 1>} : vector<8x32xi32>
    %12 = vector.broadcast %1 : vector<8x1xi32> to vector<8x32xi32>
    %13 = arith.cmpi eq, %11, %12 : vector<8x32xi32>
    %cst_4 = arith.constant 0.000000e+00 : f32
    %14 = vector.broadcast %cst_4 : f32 to vector<8x32xf32>
    %15 = arith.select %13, %0, %14 : vector<8x32xi1>, vector<8x32xf32>
    %cst_5 = arith.constant dense<0.000000e+00> : vector<8xf32>
    %16 = vector.multi_reduction <add>, %15, %cst_5 [1] : vector<8x32xf32> to vector<8xf32>
    %17 = vector.shape_cast %16 : vector<8xf32> to vector<8x1xf32>
    %18 = arith.subf %10, %17 : vector<8x1xf32>
    %19 = vector.shape_cast %18 : vector<8x1xf32> to vector<1x8x1xf32>
    %cst_6 = arith.constant dense<0.000000e+00> : vector<1xf32>
    %20 = vector.multi_reduction <add>, %19, %cst_6 [1, 2] : vector<1x8x1xf32> to vector<1xf32>
    %21 = vector.shape_cast %20 : vector<1xf32> to vector<1x1x1xf32>
    %22 = vector.extract %21[0, 0, 0] : f32 from vector<1x1x1xf32>
    %23 = vector.broadcast %22 : f32 to vector<1x8x128xf32>
    %c0_7 = arith.constant 0 : index
    %c0_8 = arith.constant 0 : index
    %c0_9 = arith.constant 0 : index
    %24 = vector.load %arg4[%c0_7, %c0_8, %c0_9] : memref<1x8x128xf32, #tpu.memory_space<vmem>>, vector<1x8x128xf32>
    tpu.vector_store %arg4[%c0_7, %c0_8, %c0_9], %23 {strides = array<i32>} : memref<1x8x128xf32, #tpu.memory_space<vmem>>, vector<1x8x128xf32>,
    return
  }
  func.func @transform_0(%arg0: i32, %arg1: i32) -> (i32, i32) {
    %c1_i32 = arith.constant 1 : i32
    %0 = arith.muli %arg0, %c1_i32 : i32
    %1 = arith.addi %0, %arg1 : i32
    %c0_i32 = arith.constant 0 : i32
    %c0_i32_0 = arith.constant 0 : i32
    return %1, %c0_i32 : i32, i32
  }
  func.func @transform_1(%arg0: i32, %arg1: i32) -> (i32, i32) {
    %c1_i32 = arith.constant 1 : i32
    %0 = arith.muli %arg0, %c1_i32 : i32
    %1 = arith.addi %0, %arg1 : i32
    %c0_i32 = arith.constant 0 : i32
    %c0_i32_0 = arith.constant 0 : i32
    return %1, %c0_i32 : i32, i32
  }
  func.func @transform_2(%arg0: i32, %arg1: i32) -> (i32, i32, i32) {
    %c0_i32 = arith.constant 0 : i32
    %c0_i32_0 = arith.constant 0 : i32
    %c0_i32_1 = arith.constant 0 : i32
    return %arg0, %c0_i32, %c0_i32_0 : i32, i32, i32
  }
}

</mosaic_0001>

<bundles_post_ra>
// kernel: tpu_custom_call.1
= control target key start
LH: loop header
LB: loop body
LE: loop exit
PB: predicated region body
PF: predicated region fallthrough
CT: control target
= control target key end

     0   :  { %vm48_vm0 = vcmask 261120   ;;  %s182_s0 = inlined_call_operand.vmem [shape: f32[8,32], index: 0, kind: input, shape index: {}]   ;;  %s183_s1 = inlined_call_operand.vmem [shape: s32[8,1], index: 1, kind: input, shape index: {}]   ;;  %s184_s2 = inlined_call_operand.hbm [shape: f32[1,8,128], index: 2, kind: output, shape index: {}]  }
   0x1   :  { %v46_v0 = vld [vmem:[%s182_s0] sm:$0xff] }
   0x2   :  { %7 = vsyncpa [#allocation3], 0  ;;  %v49_v1 = vsel %vm48_vm0, %v46_v0, -inf  ;;  %v144_v2 = vmov 0   ;;  %v47_v3 = vld [vmem:[%s183_s1] sm:$0xff]  ;;  %v61_v7 = vlaneseq  ;;  %vm72_vm2 = vcmask 7168  }
   0x3   :  { %115 = vset.pattern.permute.xlu0 %v144_v2  ;;  %s145_s0 = smov [#allocation2]  }
   0x4   :  { %50 = vmax.xlane.f32.xlu0 %v49_v1  ;;  %v62_v8 = vand.u32 127, %v61_v7  ;;  %s91_s1 = sshll.u32 %s145_s0, 4  ;;  %s92_s1 = int_to_ptr.vmem [resolvable:$true] %s91_s1 }
   0x5   :  { %s120_s14 = scalar_lea.vmem %s92_s1, 128  ;;  %p125_p1 = scmp.lt.s32.totalorder %s92_s1, %s92_s1 }
   0x6   :  { %p121_p0 = scmp.ne.s32.totalorder %s92_s1, %s120_s14  ;;  %p126_p2 = scmp.lt.s32.totalorder %s120_s14, %s120_s14 }
   0x8   :  { %p127_p3 = por %p126_p2, %p125_p1 }
   0xa   :  { %p128_p4 = pnand %p127_p3, %p121_p0 }
  0x1a   :  { %64 = vperm.xlu0 %115, %v47_v3  }
  0x91   :  { %v51_v4 = vpop.xlane.xlu0 %50 }
  0x92   :  { %v52_v5 = vsub.f32 %v46_v0, %v51_v4 }
  0x94   :  { %v53_v6 = vmul.f32 1.442695, %v52_v5 }
  0x96   :  { %116 = vpow2.f32 %v53_v6 }
  0x99   :  { %v65_v9 = vpop.permute.xlu0 %64 }
  0x9a   :  { %vm66_vm1 = vcmp.eq.s32.totalorder %v62_v8, %v65_v9 }
  0x9b   :  { %v67_v11 = vsel %vm66_vm1, %v46_v0, 0.0 }
  0x9c   :  { %v68_v13 = vsel %vm48_vm0, %v67_v11, 0.0 }
  0xa0   :  { %v117_v10 = vpop.eup %116 }
  0xa1   :  { %v55_v12 = vsel %vm48_vm0, %v117_v10, 0.0 }
  0xa2   :  { %56 = vadd.xlane.f32.xlu1 %v55_v12 }
  0xa6   :  { %69 = vadd.xlane.f32.xlu1 %v68_v13 }
 0x12f   :  { %v57_v14 = vpop.xlane.xlu1 %56 }
 0x130   :  { %118 = vlog2.f32 %v57_v14 }
 0x133   :  { %v70_v17 = vpop.xlane.xlu1 %69 }
 0x13a   :  { %v119_v15 = vpop.eup %118 }
 0x13b   :  { %v59_v16 = vmul.f32 0.6931472, %v119_v15 }
 0x13d   :  { %v60_v18 = vadd.f32 %v59_v16, %v51_v4 }
 0x13f   :  { %v71_v19 = vsub.f32 %v60_v18, %v70_v17 }
 0x141   :  { %v73_v20 = vsel %vm72_vm2, %v71_v19, 0.0 }
 0x142   :  { %74 = vadd.xlane.f32.xlu1 %v73_v20 }
 0x1cf   :  { %v75_v21 = vpop.xlane.xlu1 %74 }
 0x1d0   :  { %v76_v22 = vrot.slane %v75_v21, 4 }
 0x1d2   :  { %v77_v23 = vadd.f32 %v76_v22, %v75_v21 }
 0x1d4   :  { %v78_v24 = vrot.slane %v77_v23, 2 }
 0x1d6   :  { %v79_v25 = vadd.f32 %v78_v24, %v77_v23 }
 0x1d8   :  { %v80_v26 = vrot.slane %v79_v25, 1 }
 0x1da   :  { %v81_v27 = vadd.f32 %v80_v26, %v79_v25 }
 0x1dc   :  { %111 = vpush %v81_v27 }
 0x20d   :  { %s112_s13 = spop %111 }
 0x20e   :  { %v83_v28 = vstv %s112_s13 }
 0x20f   :  { %84 = vst [vmem:[#allocation2] sm:$0xff] %v83_v28 }
 0x210   :  { %131 = shalt.err (!%p128_p4)
}
 0x211   :  { %s132_s17 = scalar_lea.hbm %s184_s2, 128 }
 0x212   :  { %p133_p5 = scmp.ne.s32.totalorder %s184_s2, %s132_s17  ;;  %p136_p6 = scmp.lt.u32.totalorder %s132_s17, %s184_s2 }
 0x214   :  { %p138_p7 = pnand %p136_p6, %p133_p5 }
 0x216   :  { %141 = shalt.err (!%p138_p7)
}
 0x217   :  { %94 = dma.vmem_to_hbm [thread:$0]  %s92_s1, 128, %s184_s2, [#allocation3]  }
 0x218   :  { %142 = dma.done.wait [#allocation3], 128  }
 0x219   :  { %143 = vsyncadd [#allocation3], 4294967168 }
 0x21a   :  { %98 = vsyncpa [#allocation3], 1 }

</bundles_post_ra>
